<compile_context>
chip_gen: v7x
topology: tpu7x:2x2x1
jax: 0.10.0
libtpu: 0.0.40
codegen_flags: <defaults>
</compile_context>

<pallas_src>
import jax
import jax.numpy as jnp
from jax.experimental import pallas as pl
from jax.experimental.pallas import tpu as pltpu

LN_EPS = 1e-5


def _round_up(a, m):
    return ((a + m - 1) // m) * m


def _cdiv(a, b):
    return (a + b - 1) // b


def _layer_norm_residual(y_f32, x_f32, gamma_f32, beta_f32):
    z = y_f32 + x_f32
    mean = jnp.mean(z, axis=-1, keepdims=True)
    centered = z - mean
    var = jnp.mean(centered * centered, axis=-1, keepdims=True)
    zn = centered * jax.lax.rsqrt(var + LN_EPS)
    return zn * gamma_f32 + beta_f32


def _ffn_kernel_resident(x_ref, w1_ref, b1_ref, w2_ref, b2_ref,
                         gamma_ref, beta_ref, o_ref):
    """Fast path: full d_ff slab resident in VMEM (weights DMA'd once)."""
    x = x_ref[...]
    h = jnp.dot(x, w1_ref[...], preferred_element_type=jnp.float32)
    h = jnp.maximum(h + b1_ref[...], 0.0)
    y = jnp.dot(h.astype(w2_ref.dtype), w2_ref[...],
                preferred_element_type=jnp.float32)
    y = y + b2_ref[...]
    # TODO(synk): dropout is implemented as identity (eval-mode semantics).
    out = _layer_norm_residual(y, x.astype(jnp.float32),
                               gamma_ref[...], beta_ref[...])
    o_ref[...] = out.astype(o_ref.dtype)


def _ffn_kernel_tiled(x_ref, w1_ref, b1_ref, w2_ref, b2_ref,
                      gamma_ref, beta_ref, o_ref, acc_ref):
    """d_ff-tiled path: f32 accumulator over the reduction ("arbitrary") axis."""
    k = pl.program_id(1)

    @pl.when(k == 0)
    def _():
        acc_ref[...] = jnp.zeros_like(acc_ref)

    x = x_ref[...]
    # Partial linear1 + ReLU for this d_ff slab (ReLU is elementwise over d_ff,
    # so applying it per-slab before this slab's linear2 contribution is exact).
    h = jnp.dot(x, w1_ref[...], preferred_element_type=jnp.float32)
    h = jnp.maximum(h + b1_ref[...], 0.0)
    acc_ref[...] += jnp.dot(h.astype(w2_ref.dtype), w2_ref[...],
                            preferred_element_type=jnp.float32)

    @pl.when(k == pl.num_programs(1) - 1)
    def _():
        y = acc_ref[...] + b2_ref[...]
        # TODO(synk): dropout is implemented as identity (eval-mode semantics).
        out = _layer_norm_residual(y, x.astype(jnp.float32),
                                   gamma_ref[...], beta_ref[...])
        o_ref[...] = out.astype(o_ref.dtype)


def positionwise_ffn(x, w1, b1, w2, b2, gamma, beta, *,
                     tm=512, tk_ff=None, compute_dtype=None):
    """x: (batch, seq, d_in); returns (batch, seq, d_model).

    w1: (d_in, d_ff), b1: (d_ff,), w2: (d_ff, d_model), b2: (d_model,),
    gamma/beta: (d_model,). Requires d_in == d_model (d_context == 0), as in
    the PyTorch module's forward. `tk_ff=None` lets the wrapper auto-select
    (full weight residency when it fits VMEM); passing tk_ff forces d_ff tiling.
    """
    batch, seq, d_in = x.shape
    d_ff = w1.shape[1]
    d_model = w2.shape[1]
    assert w1.shape[0] == d_in and w2.shape[0] == d_ff
    assert d_in == d_model, "residual add requires input feature dim == d_model"

    n = batch * seq
    x2 = x.reshape(n, d_in)

    # Matching matmul operand dtypes (bf16 operands hit the bf16 MXU rate).
    if compute_dtype is None:
        compute_dtype = x.dtype
    compute_dtype = jnp.dtype(compute_dtype)
    x2 = x2.astype(compute_dtype)
    w1c = w1.astype(compute_dtype)
    w2c = w2.astype(compute_dtype)
    # Small params pre-cast to f32 once: biases add onto the f32 accumulator,
    # gamma/beta apply after the f32 LayerNorm.
    b1f = b1.reshape(1, d_ff).astype(jnp.float32)
    b2f = b2.reshape(1, d_model).astype(jnp.float32)
    gammaf = gamma.reshape(1, d_model).astype(jnp.float32)
    betaf = beta.reshape(1, d_model).astype(jnp.float32)

    x_b = x2.dtype.itemsize
    w_b = w1c.dtype.itemsize
    o_b = jnp.dtype(x.dtype).itemsize

    # --- generation-aware VMEM budget (v5e/v6e: 128 MiB, v7x: 64 MiB) ---
    try:
        info = pltpu.get_tpu_info()
        vmem_cap = int(getattr(info, "vmem_capacity_bytes", 64 * 1024 * 1024))
    except Exception:
        vmem_cap = 64 * 1024 * 1024
    vmem_cap = max(vmem_cap, 32 * 1024 * 1024)
    budget = int(vmem_cap * 0.80)

    # --- row tiling (no jnp.pad; ragged tails use Pallas partial edge blocks) ---
    tm = int(tm)
    if tm >= n:
        tm = n                              # single full-extent row block
    else:
        tm = max(8, (tm // 8) * 8)          # multiple of 8; last block may be partial
    nt = _cdiv(n, tm)
    # Keep the parallel row axis balanced across v7x's two TensorCores.
    if tm == n and n >= 1024:
        nt = 2
        tm = max(8, _round_up(_cdiv(n, nt), 8))
    elif nt > 1 and nt % 2 == 1 and n >= 1024:
        nt += 1
        tm = max(8, _round_up(_cdiv(n, nt), 8))
    nt = _cdiv(n, tm)

    def est_resident(tm_, dff_):
        return (2 * tm_ * d_in * x_b            # x tile (double-buffered)
                + 2 * d_in * dff_ * w_b         # W1 (counted double-buffered)
                + 2 * dff_ * 4                  # b1
                + 2 * dff_ * d_model * w_b      # W2
                + 2 * 3 * d_model * 4           # b2, gamma, beta
                + 2 * tm_ * d_model * o_b       # out tile
                + tm_ * dff_ * 4                # h intermediate (f32)
                + tm_ * d_model * 4)            # LN temporaries

    # --- d_ff tiling: prefer full residency; otherwise largest lane-dense slab
    # that fits the budget, zero-padding d_ff so the grid divides exactly. ---
    force_tiled = tk_ff is not None
    if (not force_tiled) and est_resident(tm, d_ff) <= budget:
        tk_sel, dff_pad = d_ff, d_ff
    else:
        if force_tiled:
            tk_sel = max(128, _round_up(min(int(tk_ff), d_ff), 128))
        else:
            def solve_tk(tm_):
                fixed = (2 * tm_ * d_in * x_b + 2 * 3 * d_model * 4
                         + 2 * tm_ * d_model * o_b + tm_ * d_model * 4)
                per_tk = 2 * d_in * w_b + 2 * 4 + 2 * d_model * w_b + tm_ * 4
                return ((budget - fixed) // per_tk) // 128 * 128
            tk_sel = solve_tk(tm)
            while tk_sel < 128 and tm > 8:
                tm = max(8, _round_up(tm // 2, 8))
                tk_sel = solve_tk(tm)
            tk_sel = max(128, min(int(tk_sel), _round_up(d_ff, 128)))
        dff_pad = _round_up(d_ff, tk_sel)
    kff_steps = dff_pad // tk_sel
    nt = _cdiv(n, tm)

    if dff_pad != d_ff:
        # Zero-padded d_ff columns contribute ReLU(0)+0 -> 0 to linear2: exact.
        pad = dff_pad - d_ff
        w1c = jnp.pad(w1c, ((0, 0), (0, pad)))
        b1f = jnp.pad(b1f, ((0, 0), (0, pad)))
        w2c = jnp.pad(w2c, ((0, pad), (0, 0)))

    def est_tiled(tm_, tk_):
        return (2 * tm_ * d_in * x_b
                + 2 * d_in * tk_ * w_b
                + 2 * tk_ * 4
                + 2 * tk_ * d_model * w_b
                + 2 * 3 * d_model * 4
                + 2 * tm_ * d_model * o_b
                + tm_ * tk_ * 4                 # h intermediate (f32)
                + tm_ * d_model * 4)            # f32 accumulator scratch

    if kff_steps == 1:
        # Fast path: weights resident (constant index maps), no accumulator.
        est = est_resident(tm, dff_pad)
        grid = (nt,)
        dim_sem = ("parallel",)
        in_specs = [
            pl.BlockSpec((tm, d_in), lambda i: (i, 0)),            # x rows
            pl.BlockSpec((d_in, dff_pad), lambda i: (0, 0)),       # W1 (resident)
            pl.BlockSpec((1, dff_pad), lambda i: (0, 0)),          # b1
            pl.BlockSpec((dff_pad, d_model), lambda i: (0, 0)),    # W2 (resident)
            pl.BlockSpec((1, d_model), lambda i: (0, 0)),          # b2
            pl.BlockSpec((1, d_model), lambda i: (0, 0)),          # gamma
            pl.BlockSpec((1, d_model), lambda i: (0, 0)),          # beta
        ]
        out_specs = pl.BlockSpec((tm, d_model), lambda i: (i, 0))
        scratch_shapes = []
        kernel = _ffn_kernel_resident
    else:
        est = est_tiled(tm, tk_sel)
        grid = (nt, kff_steps)
        dim_sem = ("parallel", "arbitrary")
        in_specs = [
            pl.BlockSpec((tm, d_in), lambda i, k: (i, 0)),         # x rows
            pl.BlockSpec((d_in, tk_sel), lambda i, k: (0, k)),     # W1 slab
            pl.BlockSpec((1, tk_sel), lambda i, k: (0, k)),        # b1 slab
            pl.BlockSpec((tk_sel, d_model), lambda i, k: (k, 0)),  # W2 slab
            pl.BlockSpec((1, d_model), lambda i, k: (0, 0)),       # b2
            pl.BlockSpec((1, d_model), lambda i, k: (0, 0)),       # gamma
            pl.BlockSpec((1, d_model), lambda i, k: (0, 0)),       # beta
        ]
        out_specs = pl.BlockSpec((tm, d_model), lambda i, k: (i, 0))
        scratch_shapes = [pltpu.VMEM((tm, d_model), jnp.float32)]
        kernel = _ffn_kernel_tiled

    vmem_limit = int(max(est + est // 4 + (4 << 20), 32 << 20))
    vmem_limit = int(min(vmem_limit, int(vmem_cap * 0.90)))

    # Advisory cost estimate so XLA can overlap surrounding ops.
    flops = 2 * n * dff_pad * (d_in + d_model)
    bytes_accessed = (n * d_in * x_b + n * d_model * o_b
                      + d_in * dff_pad * w_b + dff_pad * d_model * w_b
                      + dff_pad * 4 + 3 * d_model * 4)
    if kff_steps > 1:
        # Weight slabs re-streamed once per row tile when d_ff is tiled.
        bytes_accessed += (nt - 1) * (d_in * dff_pad + dff_pad * d_model) * w_b
    cost = pl.CostEstimate(flops=int(flops), transcendentals=int(n),
                           bytes_accessed=int(bytes_accessed))

    out2 = pl.pallas_call(
        kernel,
        out_shape=jax.ShapeDtypeStruct((n, d_model), x.dtype),
        grid_spec=pltpu.PrefetchScalarGridSpec(
            num_scalar_prefetch=0,
            grid=grid,
            in_specs=in_specs,
            out_specs=out_specs,
            scratch_shapes=scratch_shapes),
        compiler_params=pltpu.CompilerParams(
            dimension_semantics=dim_sem,
            vmem_limit_bytes=vmem_limit),
        cost_estimate=cost,
    )(x2, w1c, b1f, w2c, b2f, gammaf, betaf)

    return out2.reshape(batch, seq, d_model)


def _reference(x, w1, b1, w2, b2, gamma, beta):
    h = jnp.maximum(x @ w1 + b1, 0.0)
    y = h @ w2 + b2
    z = y + x
    mean = jnp.mean(z, axis=-1, keepdims=True)
    var = jnp.mean((z - mean) ** 2, axis=-1, keepdims=True)
    zn = (z - mean) / jnp.sqrt(var + LN_EPS)
    return zn * gamma + beta


if __name__ == "__main__":
    # Small, lane-dense shapes consistent with the module's forward:
    # d_context must be 0 for residual + layer_norm to type-check.
    d_model, d_ff, d_context = 128, 256, 0
    d_in = d_model + 2 * d_context
    batch, seq = 2, 8

    key = jax.random.PRNGKey(0)
    kx, k1, k2, k3, k4 = jax.random.split(key, 5)

    x = jax.random.normal(kx, (batch, seq, d_in), dtype=jnp.float32)

    # Deterministic parameter init (Kaiming-uniform-ish bounds, like nn.Linear).
    lim1 = 1.0 / jnp.sqrt(jnp.float32(d_in))
    lim2 = 1.0 / jnp.sqrt(jnp.float32(d_ff))
    w1 = jax.random.uniform(k1, (d_in, d_ff), jnp.float32, -lim1, lim1)
    b1 = jax.random.uniform(k2, (d_ff,), jnp.float32, -lim1, lim1)
    w2 = jax.random.uniform(k3, (d_ff, d_model), jnp.float32, -lim2, lim2)
    b2 = jax.random.uniform(k4, (d_model,), jnp.float32, -lim2, lim2)
    gamma = jnp.ones((d_model,), jnp.float32)
    beta = jnp.zeros((d_model,), jnp.float32)

    ref = _reference(x, w1, b1, w2, b2, gamma, beta)

    # 1) Auto path: weights fit in VMEM -> resident single-slab kernel.
    out_a = jax.block_until_ready(
        positionwise_ffn(x, w1, b1, w2, b2, gamma, beta))
    assert out_a.shape == (batch, seq, d_model)
    assert jnp.allclose(out_a, ref, atol=2e-4, rtol=2e-4), "resident path mismatch"

    # 2) Forced d_ff tiling: exercises the f32-accumulator reduction path.
    out_b = jax.block_until_ready(
        positionwise_ffn(x, w1, b1, w2, b2, gamma, beta, tk_ff=128))
    assert jnp.allclose(out_b, ref, atol=2e-4, rtol=2e-4), "tiled path mismatch"

    # 3) Ragged row count (n = 21 not divisible by tm): partial edge blocks,
    #    no wrapper-side padding of the activations.
    x3 = jax.random.normal(kx, (3, 7, d_in), dtype=jnp.float32)
    ref3 = _reference(x3, w1, b1, w2, b2, gamma, beta)
    out_c = jax.block_until_ready(
        positionwise_ffn(x3, w1, b1, w2, b2, gamma, beta, tm=16))
    assert out_c.shape == (3, 7, d_model)
    assert jnp.allclose(out_c, ref3, atol=2e-4, rtol=2e-4), "ragged path mismatch"

    print("KERNEL_OK")
</pallas_src>

<mosaic_0001>
module attributes {stable_mosaic.version = 11 : i64} {
  func.func @_ffn_kernel_resident(%arg0: i32, %arg1: memref<16x128xf32, #tpu.memory_space<vmem>>, %arg2: memref<128x256xf32, #tpu.memory_space<vmem>>, %arg3: memref<1x256xf32, #tpu.memory_space<vmem>>, %arg4: memref<256x128xf32, #tpu.memory_space<vmem>>, %arg5: memref<1x128xf32, #tpu.memory_space<vmem>>, %arg6: memref<1x128xf32, #tpu.memory_space<vmem>>, %arg7: memref<1x128xf32, #tpu.memory_space<vmem>>, %arg8: memref<16x128xf32, #tpu.memory_space<vmem>>) attributes {dimension_semantics = [#tpu.dimension_semantics<parallel>], iteration_bounds = array<i64: 1>, scalar_prefetch = 0 : i64, scratch_operands = 0 : i64, tpu.core_type = #tpu.core_type<tc>, window_params = [{transform_indices = @transform_0, window_bounds = array<i64: 16, 128>}, {pipeline_mode = #tpu.pipeline_mode<synchronous>, transform_indices = @transform_1, window_bounds = array<i64: 128, 256>}, {pipeline_mode = #tpu.pipeline_mode<synchronous>, transform_indices = @transform_2, window_bounds = array<i64: 1, 256>}, {pipeline_mode = #tpu.pipeline_mode<synchronous>, transform_indices = @transform_3, window_bounds = array<i64: 256, 128>}, {pipeline_mode = #tpu.pipeline_mode<synchronous>, transform_indices = @transform_4, window_bounds = array<i64: 1, 128>}, {pipeline_mode = #tpu.pipeline_mode<synchronous>, transform_indices = @transform_5, window_bounds = array<i64: 1, 128>}, {pipeline_mode = #tpu.pipeline_mode<synchronous>, transform_indices = @transform_6, window_bounds = array<i64: 1, 128>}, {transform_indices = @transform_7, window_bounds = array<i64: 16, 128>}]} {
    %c0 = arith.constant 0 : index
    %c0_0 = arith.constant 0 : index
    %0 = vector.load %arg1[%c0, %c0_0] : memref<16x128xf32, #tpu.memory_space<vmem>>, vector<16x128xf32>
    %c0_1 = arith.constant 0 : index
    %c0_2 = arith.constant 0 : index
    %1 = vector.load %arg2[%c0_1, %c0_2] : memref<128x256xf32, #tpu.memory_space<vmem>>, vector<128x256xf32>
    %cst = arith.constant dense<0.000000e+00> : vector<16x256xf32>
    %2 = tpu.matmul %0, %1, %cst {dimension_numbers = #tpu.dot_dimension_numbers<[1], [0], [0], [1], [0, 0, 1, 1], [], []>} : vector<16x128xf32>, vector<128x256xf32>, vector<16x256xf32> -> vector<16x256xf32>
    %c0_3 = arith.constant 0 : index
    %c0_4 = arith.constant 0 : index
    %3 = vector.load %arg3[%c0_3, %c0_4] : memref<1x256xf32, #tpu.memory_space<vmem>>, vector<1x256xf32>
    %4 = vector.broadcast %3 : vector<1x256xf32> to vector<16x256xf32>
    %5 = arith.addf %2, %4 : vector<16x256xf32>
    %cst_5 = arith.constant 0.000000e+00 : f32
    %6 = vector.broadcast %cst_5 : f32 to vector<16x256xf32>
    %7 = arith.maximumf %5, %6 : vector<16x256xf32>
    %c0_6 = arith.constant 0 : index
    %c0_7 = arith.constant 0 : index
    %8 = vector.load %arg4[%c0_6, %c0_7] : memref<256x128xf32, #tpu.memory_space<vmem>>, vector<256x128xf32>
    %cst_8 = arith.constant dense<0.000000e+00> : vector<16x128xf32>
    %9 = tpu.matmul %7, %8, %cst_8 {dimension_numbers = #tpu.dot_dimension_numbers<[1], [0], [0], [1], [0, 0, 1, 1], [], []>} : vector<16x256xf32>, vector<256x128xf32>, vector<16x128xf32> -> vector<16x128xf32>
    %c0_9 = arith.constant 0 : index
    %c0_10 = arith.constant 0 : index
    %10 = vector.load %arg5[%c0_9, %c0_10] : memref<1x128xf32, #tpu.memory_space<vmem>>, vector<1x128xf32>
    %11 = vector.broadcast %10 : vector<1x128xf32> to vector<16x128xf32>
    %12 = arith.addf %9, %11 : vector<16x128xf32>
    %c0_11 = arith.constant 0 : index
    %c0_12 = arith.constant 0 : index
    %13 = vector.load %arg6[%c0_11, %c0_12] : memref<1x128xf32, #tpu.memory_space<vmem>>, vector<1x128xf32>
    %c0_13 = arith.constant 0 : index
    %c0_14 = arith.constant 0 : index
    %14 = vector.load %arg7[%c0_13, %c0_14] : memref<1x128xf32, #tpu.memory_space<vmem>>, vector<1x128xf32>
    %15 = arith.addf %12, %0 : vector<16x128xf32>
    %cst_15 = arith.constant dense<0.000000e+00> : vector<16xf32>
    %16 = vector.multi_reduction <add>, %15, %cst_15 [1] : vector<16x128xf32> to vector<16xf32>
    %17 = vector.shape_cast %16 : vector<16xf32> to vector<16x1xf32>
    %cst_16 = arith.constant 1.280000e+02 : f32
    %18 = vector.broadcast %cst_16 : f32 to vector<16x1xf32>
    %19 = arith.divf %17, %18 : vector<16x1xf32>
    %20 = vector.broadcast %19 : vector<16x1xf32> to vector<16x128xf32>
    %21 = arith.subf %15, %20 : vector<16x128xf32>
    %22 = arith.mulf %21, %21 : vector<16x128xf32>
    %cst_17 = arith.constant dense<0.000000e+00> : vector<16xf32>
    %23 = vector.multi_reduction <add>, %22, %cst_17 [1] : vector<16x128xf32> to vector<16xf32>
    %24 = vector.shape_cast %23 : vector<16xf32> to vector<16x1xf32>
    %cst_18 = arith.constant 1.280000e+02 : f32
    %25 = vector.broadcast %cst_18 : f32 to vector<16x1xf32>
    %26 = arith.divf %24, %25 : vector<16x1xf32>
    %cst_19 = arith.constant 9.99999974E-6 : f32
    %27 = vector.broadcast %cst_19 : f32 to vector<16x1xf32>
    %28 = arith.addf %26, %27 : vector<16x1xf32>
    %29 = math.rsqrt %28 : vector<16x1xf32>
    %30 = vector.broadcast %29 : vector<16x1xf32> to vector<16x128xf32>
    %31 = arith.mulf %21, %30 : vector<16x128xf32>
    %32 = vector.broadcast %13 : vector<1x128xf32> to vector<16x128xf32>
    %33 = arith.mulf %31, %32 : vector<16x128xf32>
    %34 = vector.broadcast %14 : vector<1x128xf32> to vector<16x128xf32>
    %35 = arith.addf %33, %34 : vector<16x128xf32>
    %c0_20 = arith.constant 0 : index
    %c0_21 = arith.constant 0 : index
    %36 = vector.load %arg8[%c0_20, %c0_21] : memref<16x128xf32, #tpu.memory_space<vmem>>, vector<16x128xf32>
    tpu.vector_store %arg8[%c0_20, %c0_21], %35 {strides = array<i32>} : memref<16x128xf32, #tpu.memory_space<vmem>>, vector<16x128xf32>,
    return
  }
  func.func @transform_0(%arg0: i32) -> (i32, i32) {
    %c0_i32 = arith.constant 0 : i32
    %c0_i32_0 = arith.constant 0 : i32
    return %arg0, %c0_i32 : i32, i32
  }
  func.func @transform_1(%arg0: i32) -> (i32, i32) {
    %c0_i32 = arith.constant 0 : i32
    %c0_i32_0 = arith.constant 0 : i32
    %c0_i32_1 = arith.constant 0 : i32
    return %c0_i32, %c0_i32_0 : i32, i32
  }
  func.func @transform_2(%arg0: i32) -> (i32, i32) {
    %c0_i32 = arith.constant 0 : i32
    %c0_i32_0 = arith.constant 0 : i32
    %c0_i32_1 = arith.constant 0 : i32
    return %c0_i32, %c0_i32_0 : i32, i32
  }
  func.func @transform_3(%arg0: i32) -> (i32, i32) {
    %c0_i32 = arith.constant 0 : i32
    %c0_i32_0 = arith.constant 0 : i32
    %c0_i32_1 = arith.constant 0 : i32
    return %c0_i32, %c0_i32_0 : i32, i32
  }
  func.func @transform_4(%arg0: i32) -> (i32, i32) {
    %c0_i32 = arith.constant 0 : i32
    %c0_i32_0 = arith.constant 0 : i32
    %c0_i32_1 = arith.constant 0 : i32
    return %c0_i32, %c0_i32_0 : i32, i32
  }
  func.func @transform_5(%arg0: i32) -> (i32, i32) {
    %c0_i32 = arith.constant 0 : i32
    %c0_i32_0 = arith.constant 0 : i32
    %c0_i32_1 = arith.constant 0 : i32
    return %c0_i32, %c0_i32_0 : i32, i32
  }
  func.func @transform_6(%arg0: i32) -> (i32, i32) {
    %c0_i32 = arith.constant 0 : i32
    %c0_i32_0 = arith.constant 0 : i32
    %c0_i32_1 = arith.constant 0 : i32
    return %c0_i32, %c0_i32_0 : i32, i32
  }
  func.func @transform_7(%arg0: i32) -> (i32, i32) {
    %c0_i32 = arith.constant 0 : i32
    %c0_i32_0 = arith.constant 0 : i32
    return %arg0, %c0_i32 : i32, i32
  }
}

</mosaic_0001>

<bundles_post_ra>
// kernel: tpu_custom_call.1
= control target key start
LH: loop header
LB: loop body
LE: loop exit
PB: predicated region body
PF: predicated region fallthrough
CT: control target
= control target key end

     0   :  { %12 = vsyncpa [#allocation3], 0  ;;  %s704_s0 = inlined_call_operand.hbm [shape: f32[16,128], index: 0, kind: input, shape index: {}]   ;;  %s705_s1 = inlined_call_operand.hbm [shape: f32[128,256], index: 1, kind: input, shape index: {}]   ;;  %s706_s2 = inlined_call_operand.vmem [shape: f32[1,256], index: 2, kind: input, shape index: {}]   ;;  %s707_s3 = inlined_call_operand.hbm [shape: f32[256,128], index: 3, kind: input, shape index: {}]   ;;  %s708_s4 = inlined_call_operand.vmem [shape: f32[1,128], index: 4, kind: input, shape index: {}]   ;;  %s709_s5 = inlined_call_operand.vmem [shape: f32[1,128], index: 5, kind: input, shape index: {}]   ;;  %s710_s6 = inlined_call_operand.vmem [shape: f32[1,128], index: 6, kind: input, shape index: {}]   ;;  %s711_s7 = inlined_call_operand.hbm [shape: f32[16,128], index: 7, kind: output, shape index: {}]  }
   0x1   :  { %13 = vsyncpa [#allocation6], 0 }
   0x2   :  { %14 = vsyncpa [#allocation4], 0  ;;  %s584_s24 = smov [#allocation5]   ;;  %s490_s28 = scalar_lea.hbm %s705_s1, 4096 }
   0x3   :  { %s32_s25 = sshll.u32 %s584_s24, 4  ;;  %p491_p0 = scmp.ne.s32.totalorder %s705_s1, %s490_s28  ;;  %s33_s25 = int_to_ptr.vmem [resolvable:$true] %s32_s25 }
   0x4   :  { %p494_p1 = scmp.lt.u32.totalorder %s490_s28, %s705_s1 }
   0x6   :  { %p496_p2 = pnand %p494_p1, %p491_p0 }
   0x8   :  { %499 = shalt.err (!%p496_p2)
}
   0x9   :  { %s500_s10 = scalar_lea.vmem %s33_s25, 4096  ;;  %p505_p4 = scmp.lt.s32.totalorder %s33_s25, %s33_s25 }
   0xa   :  { %p501_p3 = scmp.ne.s32.totalorder %s33_s25, %s500_s10  ;;  %p506_p5 = scmp.lt.s32.totalorder %s500_s10, %s500_s10 }
   0xc   :  { %p507_p6 = por %p506_p5, %p505_p4 }
   0xe   :  { %p508_p7 = pnand %p507_p6, %p501_p3 }
  0x10   :  { %511 = shalt.err (!%p508_p7)
}
  0x11   :  { %s585_s11 = smov 256   ;;  %s586_s12 = smov 16  }
  0x12   :  { %38 = dma.hbm_to_vmem [thread:$0]  %s705_s1, 4096, %s33_s25, [#allocation6], %s585_s11, %s585_s11, %s586_s12  }
  0x13   :  { %s587_s15 = smov [#allocation2]   ;;  %s512_s19 = scalar_lea.hbm %s704_s0, 256 }
  0x14   :  { %s20_s16 = sshll.u32 %s587_s15, 4  ;;  %p513_p8 = scmp.ne.s32.totalorder %s704_s0, %s512_s19  ;;  %s21_s16 = int_to_ptr.vmem [resolvable:$true] %s20_s16 }
  0x15   :  { %p516_p9 = scmp.lt.u32.totalorder %s512_s19, %s704_s0 }
  0x17   :  { %p518_p10 = pnand %p516_p9, %p513_p8 }
  0x19   :  { %521 = shalt.err (!%p518_p10)
}
  0x1a   :  { %s522_s24 = scalar_lea.vmem %s21_s16, 256  ;;  %p527_p12 = scmp.lt.s32.totalorder %s21_s16, %s21_s16 }
  0x1b   :  { %p523_p11 = scmp.ne.s32.totalorder %s21_s16, %s522_s24  ;;  %p528_p13 = scmp.lt.s32.totalorder %s522_s24, %s522_s24 }
  0x1d   :  { %p529_p0 = por %p528_p13, %p527_p12 }
  0x1f   :  { %p530_p1 = pnand %p529_p0, %p523_p11 }
  0x21   :  { %533 = shalt.err (!%p530_p1)
}
  0x22   :  { %s588_s1 = smov 128   ;;  %s589_s25 = smov 8  }
  0x23   :  { %26 = dma.hbm_to_vmem [thread:$0]  %s704_s0, 256, %s21_s16, [#allocation3], %s588_s1, %s588_s1, %s589_s25  }
  0x24   :  { %s590_s28 = smov [#allocation7]   ;;  %s534_s9 = scalar_lea.hbm %s707_s3, 4096 }
  0x25   :  { %s46_s29 = sshll.u32 %s590_s28, 4  ;;  %p535_p2 = scmp.ne.s32.totalorder %s707_s3, %s534_s9  ;;  %s47_s29 = int_to_ptr.vmem [resolvable:$true] %s46_s29 }
  0x26   :  { %p538_p3 = scmp.lt.u32.totalorder %s534_s9, %s707_s3 }
  0x28   :  { %p540_p4 = pnand %p538_p3, %p535_p2 }
  0x2a   :  { %543 = shalt.err (!%p540_p4)
}
  0x2b   :  { %s544_s14 = scalar_lea.vmem %s47_s29, 4096  ;;  %p549_p6 = scmp.lt.s32.totalorder %s47_s29, %s47_s29 }
  0x2c   :  { %p545_p5 = scmp.ne.s32.totalorder %s47_s29, %s544_s14  ;;  %p550_p7 = scmp.lt.s32.totalorder %s544_s14, %s544_s14 }
  0x2e   :  { %p551_p8 = por %p550_p7, %p549_p6 }
  0x30   :  { %p552_p9 = pnand %p551_p8, %p545_p5 }
  0x32   :  { %555 = shalt.err (!%p552_p9)
}
  0x33   :  { %52 = dma.hbm_to_vmem [thread:$0]  %s707_s3, 4096, %s47_s29, [#allocation6], %s588_s1, %s588_s1, %s589_s25  }
  0x34   :  { %578 = dma.done.wait [#allocation3], 256  }
  0x35   :  { %579 = vsyncadd [#allocation3], 4294967040 }
  0x36   :  { %580 = dma.done.wait [#allocation6], 8192  }
  0x37   :  { %581 = vsyncadd [#allocation6], 4294959104  ;;  %v591_v0 = vmov 0.0   ;;  %v71_v1 = vld [vmem:[#allocation5 + $0x8] sm:$0xff]  ;;  %v73_v2 = vld [vmem:[#allocation5 + $0x18] sm:$0xff]  ;;  %s592_s21 = smov [#allocation8]  }
  0x38   :  { %178 = vmatprep.mubr.f32.mxu0 %v591_v0  ;;  %v70_v3 = vld [vmem:[#allocation5] sm:$0xff]  ;;  %v413_v4 = vpack.c.bf16 %v73_v2, %v71_v1  ;;  %v72_v5 = vld [vmem:[#allocation5 + $0x10] sm:$0xff]  ;;  %v75_v6 = vld [vmem:[#allocation5 + $0x28] sm:$0xff]  ;;  %s359_s22 = sshll.u32 %s592_s21, 4  ;;  %s360_s22 = int_to_ptr.vmem [resolvable:$true] %s359_s22 }
  0x39   :  { %v77_v7 = vld [vmem:[#allocation5 + $0x38] sm:$0xff]  ;;  %v415_v8 = vpack.c.bf16 %v72_v5, %v70_v3  ;;  %v74_v10 = vld [vmem:[#allocation5 + $0x20] sm:$0xff]  ;;  %v76_v11 = vld [vmem:[#allocation5 + $0x30] sm:$0xff]  ;;  %s556_s23 = scalar_lea.vmem %s360_s22, 256  ;;  %p561_p11 = scmp.lt.s32.totalorder %s360_s22, %s360_s22 }
  0x3a   :  { %v417_v9 = vpack.c.bf16 %v77_v7, %v75_v6  ;;  %v79_v12 = vld [vmem:[#allocation5 + $0x48] sm:$0xff]  ;;  %414 = vmatprep.subr.bf16.mxu0 %v413_v4  ;;  %v81_v13 = vld [vmem:[#allocation5 + $0x58] sm:$0xff]  ;;  %v419_v14 = vpack.c.bf16 %v76_v11, %v74_v10  ;;  %v78_v16 = vld [vmem:[#allocation5 + $0x40] sm:$0xff]  ;;  %p557_p10 = scmp.ne.s32.totalorder %s360_s22, %s556_s23  ;;  %p562_p12 = scmp.lt.s32.totalorder %s556_s23, %s556_s23 }
  0x3b   :  { %416 = vmatpush1.bf16.msra.mxu0 %v415_v8  ;;  %v421_v15 = vpack.c.bf16 %v81_v13, %v79_v12  ;;  %v80_v17 = vld [vmem:[#allocation5 + $0x50] sm:$0xff]  ;;  %v83_v18 = vld [vmem:[#allocation5 + $0x68] sm:$0xff]  ;;  %v85_v19 = vld [vmem:[#allocation5 + $0x78] sm:$0xff] }
  0x3c   :  { %418 = vmatprep.subr.bf16.mxu0 %v417_v9  ;;  %v423_v20 = vpack.c.bf16 %v80_v17, %v78_v16  ;;  %v425_v21 = vpack.c.bf16 %v85_v19, %v83_v18  ;;  %v82_v22 = vld [vmem:[#allocation5 + $0x60] sm:$0xff]  ;;  %v84_v23 = vld [vmem:[#allocation5 + $0x70] sm:$0xff]  ;;  %v87_v24 = vld [vmem:[#allocation5 + $0x88] sm:$0xff]  ;;  %p563_p13 = por %p562_p12, %p561_p11 }
  0x3d   :  { %v89_v25 = vld [vmem:[#allocation5 + $0x98] sm:$0xff]  ;;  %v86_v26 = vld [vmem:[#allocation5 + $0x80] sm:$0xff]  ;;  %v88_v27 = vld [vmem:[#allocation5 + $0x90] sm:$0xff]  ;;  %v427_v30 = vpack.c.bf16 %v84_v23, %v82_v22 }
  0x3e   :  { %v211_v28 = vld [vmem:[#allocation7 + $0x80] sm:$0xff]  ;;  %v212_v29 = vld [vmem:[#allocation7 + $0x88] sm:$0xff]  ;;  %v213_v35 = vld [vmem:[#allocation7 + $0x90] sm:$0xff]  ;;  %v429_v36 = vpack.c.bf16 %v89_v25, %v87_v24  ;;  %v431_v46 = vpack.c.bf16 %v88_v27, %v86_v26  ;;  %p564_p0 = pnand %p563_p13, %p557_p10 }
  0x3f   :  { %420 = vmatpush1.bf16.msra.mxu0 %v419_v14  ;;  %v91_v31 = vld [vmem:[#allocation5 + $0xa8] sm:$0xff]  ;;  %v445_v32 = vpack.c.bf16 %v212_v29, %v211_v28  ;;  %v195_v33 = vld [vmem:[#allocation7] sm:$0xff]  ;;  %v214_v38 = vld [vmem:[#allocation7 + $0x98] sm:$0xff] }
  0x40   :  { %422 = vmatprep.subr.bf16.mxu0 %v421_v15  ;;  %v196_v34 = vld [vmem:[#allocation7 + $0x8] sm:$0xff]  ;;  %v197_v39 = vld [vmem:[#allocation7 + $0x10] sm:$0xff]  ;;  %v198_v40 = vld [vmem:[#allocation7 + $0x18] sm:$0xff]  ;;  %v449_v42 = vpack.c.bf16 %v214_v38, %v213_v35 }
  0x41   :  { %v447_v37 = vpack.c.bf16 %v196_v34, %v195_v33  ;;  %v93_v41 = vld [vmem:[#allocation5 + $0xb8] sm:$0xff]  ;;  %446 = vmatprep.subr.bf16.mxu1 %v445_v32  ;;  %v215_v43 = vld [vmem:[#allocation7 + $0xa0] sm:$0xff]  ;;  %v216_v44 = vld [vmem:[#allocation7 + $0xa8] sm:$0xff]  ;;  %v451_v45 = vpack.c.bf16 %v198_v40, %v197_v39 }
  0x42   :  { %v90_v47 = vld [vmem:[#allocation5 + $0xa0] sm:$0xff]  ;;  %v453_v48 = vpack.c.bf16 %v216_v44, %v215_v43  ;;  %v200_v50 = vld [vmem:[#allocation7 + $0x28] sm:$0xff]  ;;  %v433_v51 = vpack.c.bf16 %v93_v41, %v91_v31  ;;  %v92_v52 = vld [vmem:[#allocation5 + $0xb0] sm:$0xff] }
  0x43   :  { %424 = vmatpush1.bf16.msra.mxu0 %v423_v20  ;;  %448 = vmatpush3.bf16.msra.mxu1 %v447_v37  ;;  %v199_v49 = vld [vmem:[#allocation7 + $0x20] sm:$0xff]  ;;  %v217_v53 = vld [vmem:[#allocation7 + $0xb0] sm:$0xff]  ;;  %v218_v54 = vld [vmem:[#allocation7 + $0xb8] sm:$0xff]  ;;  %v435_v58 = vpack.c.bf16 %v92_v52, %v90_v47 }
  0x44   :  { %426 = vmatprep.subr.bf16.mxu0 %v425_v21  ;;  %450 = vmatprep.subr.bf16.mxu1 %v449_v42  ;;  %v95_v55 = vld [vmem:[#allocation5 + $0xc8] sm:$0xff]  ;;  %v97_v56 = vld [vmem:[#allocation5 + $0xd8] sm:$0xff]  ;;  %v455_v57 = vpack.c.bf16 %v200_v50, %v199_v49  ;;  %v94_v59 = vld [vmem:[#allocation5 + $0xc0] sm:$0xff]  ;;  %v457_v60 = vpack.c.bf16 %v218_v54, %v217_v53 }
  0x45   :  { %v201_v61 = vld [vmem:[#allocation7 + $0x30] sm:$0xff]  ;;  %v202_v62 = vld [vmem:[#allocation7 + $0x38] sm:$0xff]  ;;  %v437_v63 = vpack.c.bf16 %v97_v56, %v95_v55  ;;  %v219_v2 = vld [vmem:[#allocation7 + $0xc0] sm:$0xff] }
  0x46   :  { %v96_v1 = vld [vmem:[#allocation5 + $0xd0] sm:$0xff]  ;;  %v220_v3 = vld [vmem:[#allocation7 + $0xc8] sm:$0xff]  ;;  %v101_v5 = vld [vmem:[#allocation5 + $0xf8] sm:$0xff]  ;;  %v459_v6 = vpack.c.bf16 %v202_v62, %v201_v61 }
  0x47   :  { %428 = vmatpush1.bf16.msra.mxu0 %v427_v30  ;;  %452 = vmatpush3.bf16.msra.mxu1 %v451_v45  ;;  %v99_v4 = vld [vmem:[#allocation5 + $0xe8] sm:$0xff]  ;;  %v439_v7 = vpack.c.bf16 %v96_v1, %v94_v59  ;;  %v98_v8 = vld [vmem:[#allocation5 + $0xe0] sm:$0xff]  ;;  %v461_v9 = vpack.c.bf16 %v220_v3, %v219_v2  ;;  %v100_v13 = vld [vmem:[#allocation5 + $0xf0] sm:$0xff] }
  0x48   :  { %430 = vmatprep.subr.bf16.mxu0 %v429_v36  ;;  %454 = vmatprep.subr.bf16.mxu1 %v453_v48  ;;  %v203_v10 = vld [vmem:[#allocation7 + $0x40] sm:$0xff]  ;;  %v204_v11 = vld [vmem:[#allocation7 + $0x48] sm:$0xff]  ;;  %v441_v12 = vpack.c.bf16 %v101_v5, %v99_v4  ;;  %v221_v14 = vld [vmem:[#allocation7 + $0xd0] sm:$0xff]  ;;  %v443_v17 = vpack.c.bf16 %v100_v13, %v98_v8  ;;  %v104_v36 = vlaneseq }
  0x49   :  { %v222_v15 = vld [vmem:[#allocation7 + $0xd8] sm:$0xff]  ;;  %v463_v16 = vpack.c.bf16 %v204_v11, %v203_v10  ;;  %v205_v19 = vld [vmem:[#allocation7 + $0x50] sm:$0xff]  ;;  %v223_v21 = vld [vmem:[#allocation7 + $0xe0] sm:$0xff] }
  0x4a   :  { %v465_v18 = vpack.c.bf16 %v222_v15, %v221_v14  ;;  %v206_v20 = vld [vmem:[#allocation7 + $0x58] sm:$0xff]  ;;  %v224_v22 = vld [vmem:[#allocation7 + $0xe8] sm:$0xff]  ;;  %v68_v24 = vld [vmem:[#allocation2] sm:$0xff]  ;;  %v105_v37 = vshrl.u32 %v104_v36, 7 }
  0x4b   :  { %432 = vmatpush1.bf16.msra.mxu0 %v431_v46  ;;  %456 = vmatpush3.bf16.msra.mxu1 %v455_v57  ;;  %v467_v23 = vpack.c.bf16 %v206_v20, %v205_v19  ;;  %v469_v25 = vpack.c.bf16 %v224_v22, %v223_v21  ;;  %v69_v26 = vld [vmem:[#allocation2 + $0x8] sm:$0xff]  ;;  %v207_v27 = vld [vmem:[#allocation7 + $0x60] sm:$0xff]  ;;  %v208_v28 = vld [vmem:[#allocation7 + $0x68] sm:$0xff] }
  0x4c   :  { %434 = vmatprep.subr.bf16.mxu0 %v433_v51  ;;  %458 = vmatprep.subr.bf16.mxu1 %v457_v60  ;;  %v471_v29 = vpack.c.bf16 %v208_v28, %v207_v27  ;;  %v225_v30 = vld [vmem:[#allocation7 + $0xf0] sm:$0xff]  ;;  %v226_v31 = vld [vmem:[#allocation7 + $0xf8] sm:$0xff]  ;;  %v106_v38 = vsub.s32 0, %v105_v37  ;;  %v110_v39 = vsub.s32 1, %v105_v37 }
  0x4d   :  { %v473_v32 = vpack.c.bf16 %v226_v31, %v225_v30  ;;  %v209_v33 = vld [vmem:[#allocation7 + $0x70] sm:$0xff]  ;;  %v210_v34 = vld [vmem:[#allocation7 + $0x78] sm:$0xff] }
  0x4e   :  { %v475_v35 = vpack.c.bf16 %v210_v34, %v209_v33  ;;  %v372_v55 = vld [vmem:[%s708_s4] ss:$0 sm:$0xff] }
  0x4f   :  { %436 = vmatpush1.bf16.msra.mxu0 %v435_v58  ;;  %460 = vmatpush3.bf16.msra.mxu1 %v459_v6  ;;  %v374_v19 = vld [vmem:[%s710_s6] ss:$0 sm:$0xff] }
  0x50   :  { %438 = vmatprep.subr.bf16.mxu0 %v437_v63  ;;  %462 = vmatprep.subr.bf16.mxu1 %v461_v9 }
  0x53   :  { %440 = vmatpush1.bf16.msra.mxu0 %v439_v7  ;;  %464 = vmatpush3.bf16.msra.mxu1 %v463_v16 }
  0x54   :  { %442 = vmatprep.subr.bf16.mxu0 %v441_v12  ;;  %466 = vmatprep.subr.bf16.mxu1 %v465_v18 }
  0x57   :  { %444 = vmatpush1.bf16.msra.mxu0 %v443_v17  ;;  %468 = vmatpush3.bf16.msra.mxu1 %v467_v23  ;;  %v373_v17 = vld [vmem:[%s709_s5] ss:$0 sm:$0xff] }
  0x58   :  { %470 = vmatprep.subr.bf16.mxu1 %v469_v25 }
  0x5a   :  { %179 = vmatmul.mubr.f32.vlgmr.msra.gmra.mrb[0].mxu0 %v68_v24 }
  0x5b   :  { %184 = vmatprep.mubr.f32.mxu0 %v591_v0  ;;  %472 = vmatpush3.bf16.msra.mxu1 %v471_v29  ;;  %v102_v0 = vld [vmem:[%s706_s2] sm:$0x3] }
  0x5c   :  { %474 = vmatprep.subr.bf16.mxu1 %v473_v32  ;;  %v107_v40 = vrot.slane %v102_v0, %v106_v38  ;;  %v111_v41 = vrot.slane %v102_v0, %v110_v39 }
  0x5e   :  { %185 = vmatmul.mubr.f32.gmra.mrb[2].mxu0 %v69_v26 }
  0x5f   :  { %476 = vmatpush3.bf16.msra.mxu1 %v475_v35 }
 0x12d   :  { %v180_v42 = vpop.f32.mrb[0].mxu0 }
 0x12e   :  { %v181_v43 = vadd.f32 %v180_v42, %v107_v40  ;;  %v182_v44 = vpop.f32.mrb[1].mxu0 }
 0x12f   :  { %v183_v45 = vadd.f32 %v182_v44, %v111_v41 }
 0x130   :  { %v191_v48 = vmax.f32 %v181_v43, 0.0 }
 0x131   :  { %v186_v46 = vpop.f32.mrb[2].mxu0  ;;  %v192_v47 = vmax.f32 %v183_v45, 0.0 }
 0x132   :  { %v187_v49 = vadd.f32 %v186_v46, %v107_v40  ;;  %v188_v50 = vpop.f32.mrb[3].mxu0 }
 0x133   :  { %v189_v51 = vadd.f32 %v188_v50, %v111_v41  ;;  %298 = vmatprep.mubr.f32.mxu1 %v192_v47 }
 0x134   :  { %299 = vmatmul.mubr.f32.vlgmr.msra.gmra.mrb[0].mxu1 %v191_v48  ;;  %v193_v53 = vmax.f32 %v187_v49, 0.0 }
 0x135   :  { %v194_v52 = vmax.f32 %v189_v51, 0.0 }
 0x137   :  { %303 = vmatprep.mubr.f32.mxu1 %v194_v52 }
 0x138   :  { %304 = vmatmul.mubr.f32.gmra.mrb[2].mxu1 %v193_v53 }
 0x207   :  { %v407_v54 = vpop.f32.mrb[0].mxu1 }
 0x208   :  { %v408_v56 = vpop.f32.mrb[1].mxu1 }
 0x209   :  { %v409_v57 = vadd.f32 %v408_v56, %v407_v54 }
 0x20b   :  { %v301_v58 = vadd.f32 %v409_v57, %v372_v55  ;;  %v410_v59 = vpop.f32.mrb[2].mxu1 }
 0x20c   :  { %v411_v60 = vpop.f32.mrb[3].mxu1 }
 0x20d   :  { %v412_v61 = vadd.f32 %v411_v60, %v410_v59  ;;  %v311_v62 = vadd.f32 %v301_v58, %v68_v24 }
 0x20f   :  { %v306_v63 = vadd.f32 %v412_v61, %v372_v55  ;;  %313 = vadd.xlane.f32.xlu0 %v311_v62 }
 0x211   :  { %v312_v1 = vadd.f32 %v306_v63, %v69_v26 }
 0x213   :  { %315 = vadd.xlane.f32.xlu0 %v312_v1 }
 0x29c   :  { %v314_v2 = vpop.xlane.xlu0 %313 }
 0x29d   :  { %v318_v3 = vmul.f32 0.0078125, %v314_v2 }
 0x29f   :  { %v320_v4 = vsub.f32 %v311_v62, %v318_v3 }
 0x2a0   :  { %v316_v5 = vpop.xlane.xlu0 %315 }
 0x2a1   :  { %v319_v6 = vmul.f32 0.0078125, %v316_v5  ;;  %v322_v7 = vmul.f32 %v320_v4, %v320_v4 }
 0x2a3   :  { %v321_v8 = vsub.f32 %v312_v1, %v319_v6  ;;  %324 = vadd.xlane.f32.xlu1 %v322_v7 }
 0x2a5   :  { %v323_v9 = vmul.f32 %v321_v8, %v321_v8 }
 0x2a7   :  { %326 = vadd.xlane.f32.xlu1 %v323_v9 }
 0x330   :  { %v325_v10 = vpop.xlane.xlu1 %324 }
 0x331   :  { %v328_v11 = vmul.f32 0.0078125, %v325_v10 }
 0x333   :  { %v330_v12 = vadd.f32 1e-05, %v328_v11 }
 0x334   :  { %v327_v13 = vpop.xlane.xlu1 %326 }
 0x335   :  { %486 = vrsqrt.f32 %v330_v12  ;;  %v329_v14 = vmul.f32 0.0078125, %v327_v13 }
 0x337   :  { %v331_v15 = vadd.f32 1e-05, %v329_v14 }
 0x339   :  { %488 = vrsqrt.f32 %v331_v15 }
 0x33f   :  { %v487_v16 = vpop.eup %486 }
 0x340   :  { %v334_v18 = vmul.f32 %v487_v16, %v320_v4 }
 0x342   :  { %v342_v20 = vmul.f32 %v373_v17, %v334_v18 }
 0x343   :  { %v489_v21 = vpop.eup %488 }
 0x344   :  { %v335_v22 = vmul.f32 %v489_v21, %v321_v8  ;;  %v350_v23 = vadd.f32 %v374_v19, %v342_v20 }
 0x346   :  { %v343_v24 = vmul.f32 %v373_v17, %v335_v22  ;;  %352 = vst [vmem:[#allocation8] sm:$0xff] %v350_v23 }
 0x348   :  { %v351_v25 = vadd.f32 %v374_v19, %v343_v24 }
 0x34a   :  { %353 = vst [vmem:[#allocation8 + $0x8] sm:$0xff] %v351_v25 }
 0x34b   :  { %567 = shalt.err (!%p564_p0)
}
 0x34c   :  { %s568_s24 = scalar_lea.hbm %s711_s7, 256 }
 0x34d   :  { %p569_p1 = scmp.ne.s32.totalorder %s711_s7, %s568_s24  ;;  %p572_p2 = scmp.lt.u32.totalorder %s568_s24, %s711_s7 }
 0x34f   :  { %p574_p3 = pnand %p572_p2, %p569_p1 }
 0x351   :  { %577 = shalt.err (!%p574_p3)
}
 0x352   :  { %365 = dma.vmem_to_hbm [thread:$0]  %s360_s22, 256, %s711_s7, [#allocation4], %s588_s1, %s588_s1, %s589_s25  }
 0x353   :  { %582 = dma.done.wait [#allocation4], 256  }
 0x354   :  { %583 = vsyncadd [#allocation4], 4294967040 }
 0x355   :  { %369 = vsyncpa [#allocation3], 1 }
 0x356   :  { %370 = vsyncpa [#allocation6], 1 }
 0x357   :  { %371 = vsyncpa [#allocation4], 1 }

</bundles_post_ra>
